<compile_context>
chip_gen: v5e
topology: v5e:2x2
jax: 0.10.0
libtpu: 0.0.40
codegen_flags: <defaults>
</compile_context>

<pallas_src>
import functools

import jax
import jax.numpy as jnp
from jax.experimental import pallas as pl
from jax.experimental.pallas import tpu as pltpu


def _rce_kernel(x_ref, t_ref, out_ref, *, batch, num_cls, ratio):
    # x_ref: (TB, C) logits tile, t_ref: (TB, 1) int32 targets tile,
    # out_ref: (1, 1, 1) f32 per-block partial loss.
    i = pl.program_id(0)
    x = x_ref[...].astype(jnp.float32)          # in-kernel upcast (bf16-safe)
    t = t_ref[...]                              # (TB, 1) int32
    tb = x.shape[0]

    # Validity of each row of the (possibly partial) last block.  All
    # reductions below are per-row, so garbage in padded rows stays in padded
    # rows and the final per-row select discards it; no full-tile pre-mask.
    row = i * tb + jax.lax.broadcasted_iota(jnp.int32, (tb, 1), 0)
    valid = row < batch                         # (TB, 1) bool

    # log p[c] = (-x[c]) - logsumexp(-x).  Recenter by the per-row max of -x
    # (= -min(x)):  d[c] = min(x) - x[c] <= 0, so both loss terms are small
    # and the large common offset cancels exactly.
    mn = jnp.min(x, axis=-1, keepdims=True)                  # (TB, 1)  [XLU]
    d = mn - x                                               # (TB, C)
    se = jnp.sum(jnp.exp(d), axis=-1, keepdims=True)         # (TB, 1)  [EUP+XLU]

    # Fused "sum over c != target" reduction (one masked lane reduce).
    col = jax.lax.broadcasted_iota(jnp.int32, d.shape, 1)    # (TB, C)
    sum_excl = jnp.sum(jnp.where(col == t, 0.0, d), axis=-1, keepdims=True)

    base = jnp.float32(ratio / (num_cls - 1))
    row_loss = -base * (sum_excl - jnp.float32(num_cls - 1) * jnp.log(se))
    row_loss = jnp.where(valid, row_loss, 0.0)               # drop padded rows

    out_ref[...] = jnp.sum(row_loss).reshape(1, 1, 1)


def _round_up_8(n):
    return ((int(n) + 7) // 8) * 8


def _vmem_limit_bytes():
    """Scoped-VMEM limit: ~3/4 of physical VMEM, capped at 96 MiB.

    v5e/v6e (128 MiB physical) -> 96 MiB; v7x (64 MiB per TC) -> 48 MiB.
    Falls back to a v7x-safe 48 MiB if the hardware query is unavailable.
    """
    try:
        cap = int(pltpu.get_tpu_info().vmem_capacity_bytes)
    except Exception:
        cap = 64 * 1024 * 1024
    return min(96 * 1024 * 1024, (cap * 3) // 4)


def _pick_block_b(B, C, itemsize, tile_budget_bytes):
    """Largest batch tile that fits the VMEM tile budget (dtype-aware).

    Per batch row resident in VMEM:
      * 2x double-buffered input-block rows at the input dtype, plus
      * ~6 live f32 (TB, C)-shaped temporaries (upcast x, d, exp(d), iota,
        masked select, headroom).
    """
    per_row = 2 * C * itemsize + 6 * C * 4
    tb = tile_budget_bytes // max(per_row, 1)
    tb = max(8, tb - tb % 8)
    # Keep at least two grid steps for large batches so the "parallel" batch
    # axis can shard across both v7x TensorCores.
    if B >= 128:
        tb = min(tb, _round_up_8(-(-B // 2)))
    if tb >= B:
        return B
    return tb


def rce_pallas(x, target, ratio=1, block_b=None):
    """Pallas implementation of RCE.forward. x: (B, C) float, target: (B,) int."""
    B, C = x.shape
    assert C > 1, "RCE needs num_cls > 1 (weight is ratio / (num_cls - 1))"

    vmem_limit = _vmem_limit_bytes()
    itemsize = int(jnp.dtype(x.dtype).itemsize)

    if block_b is None:
        block_b = _pick_block_b(B, C, itemsize, (vmem_limit * 3) // 4)
    else:
        block_b = int(block_b)
        if block_b >= B:
            block_b = B
        else:
            block_b = max(8, block_b - block_b % 8)
            if block_b >= B:
                block_b = B

    G = -(-B // block_b)
    t2 = target.astype(jnp.int32).reshape(B, 1)

    kernel = functools.partial(
        _rce_kernel, batch=B, num_cls=C, ratio=float(ratio)
    )

    # Small tiles (tiny C / B) + several grid steps: deepen the input pipeline
    # so DMA-issue latency hides behind the few-microsecond per-step compute.
    logits_block_bytes = block_b * C * itemsize
    if G >= 3 and logits_block_bytes < (512 * 1024):
        logits_spec = pl.BlockSpec((block_b, C), lambda i: (i, 0),
                                   pipeline_mode=pl.Buffered(3))
    else:
        logits_spec = pl.BlockSpec((block_b, C), lambda i: (i, 0))

    partials = pl.pallas_call(
        kernel,
        out_shape=jax.ShapeDtypeStruct((G, 1, 1), jnp.float32),
        grid_spec=pltpu.PrefetchScalarGridSpec(
            num_scalar_prefetch=0,
            grid=(G,),
            in_specs=[
                logits_spec,
                pl.BlockSpec((block_b, 1), lambda i: (i, 0)),
            ],
            out_specs=pl.BlockSpec((1, 1, 1), lambda i: (i, 0, 0)),
        ),
        compiler_params=pltpu.CompilerParams(
            dimension_semantics=("parallel",),
            vmem_limit_bytes=int(vmem_limit),
        ),
        cost_estimate=pl.CostEstimate(
            flops=5 * B * C,
            transcendentals=B * C + B,
            bytes_accessed=itemsize * B * C + 4 * B + 4 * G,
        ),
    )(x, t2)

    return jnp.sum(partials)


def rce_reference(x, target, ratio=1):
    """Pure-JAX reference matching the PyTorch module exactly."""
    B, C = x.shape
    p = jax.nn.softmax(-x.astype(jnp.float32), axis=-1)     # (B, C)
    w = jnp.full((B, C), ratio / (C - 1), dtype=jnp.float32)
    w = w.at[jnp.arange(B), target].set(0.0)
    entropy = -jnp.sum(w * jnp.log(p), axis=-1)              # (B,)
    return jnp.sum(entropy)


if __name__ == "__main__":
    key = jax.random.PRNGKey(0)
    k1, k2, k3, k4, k5, k6 = jax.random.split(key, 6)

    # Small case: batch=8, num_cls=16 (single full block, G=1).
    B, num_cls = 8, 16
    x = jax.random.normal(k1, (B, num_cls), dtype=jnp.float32)
    target = jax.random.randint(k2, (B,), 0, num_cls, dtype=jnp.int32)
    out = jax.block_until_ready(rce_pallas(x, target, ratio=1))
    ref = jax.block_until_ready(rce_reference(x, target, ratio=1))
    assert jnp.allclose(out, ref, rtol=1e-5, atol=1e-4), (out, ref)

    # Partial last block + deep (3-buffer) pipeline path (B % block_b != 0).
    B2, C2 = 20, 16
    x2 = jax.random.normal(k3, (B2, C2), dtype=jnp.float32)
    t2 = jax.random.randint(k4, (B2,), 0, C2, dtype=jnp.int32)
    out2 = jax.block_until_ready(rce_pallas(x2, t2, ratio=2, block_b=8))
    ref2 = jax.block_until_ready(rce_reference(x2, t2, ratio=2))
    assert jnp.allclose(out2, ref2, rtol=1e-5, atol=1e-4), (out2, ref2)

    # bf16 inputs + auto block picking with the G>=2 megacore split (B >= 128).
    B3, C3 = 160, 40
    x3 = jax.random.normal(k5, (B3, C3), dtype=jnp.float32).astype(jnp.bfloat16)
    t3 = jax.random.randint(k6, (B3,), 0, C3, dtype=jnp.int32)
    out3 = jax.block_until_ready(rce_pallas(x3, t3, ratio=0.7))
    ref3 = jax.block_until_ready(rce_reference(x3, t3, ratio=0.7))
    assert jnp.allclose(out3, ref3, rtol=1e-4, atol=1e-3), (out3, ref3)

    print("KERNEL_OK")
</pallas_src>

<mosaic_0001>
module attributes {stable_mosaic.version = 11 : i64} {
  func.func @_rce_kernel(%arg0: i32, %arg1: memref<8x16xf32, #tpu.memory_space<vmem>>, %arg2: memref<8x1xi32, #tpu.memory_space<vmem>>, %arg3: memref<1x1x1xf32, #tpu.memory_space<vmem>>) attributes {dimension_semantics = [#tpu.dimension_semantics<parallel>], iteration_bounds = array<i64: 1>, scalar_prefetch = 0 : i64, scratch_operands = 0 : i64, tpu.core_type = #tpu.core_type<tc>, window_params = [{transform_indices = @transform_0, window_bounds = array<i64: 8, 16>}, {transform_indices = @transform_1, window_bounds = array<i64: 8, 1>}, {transform_indices = @transform_2, window_bounds = array<i64: 1, 1, 1>}]} {
    %c0 = arith.constant 0 : index
    %c0_0 = arith.constant 0 : index
    %0 = vector.load %arg1[%c0, %c0_0] : memref<8x16xf32, #tpu.memory_space<vmem>>, vector<8x16xf32>
    %c0_1 = arith.constant 0 : index
    %c0_2 = arith.constant 0 : index
    %1 = vector.load %arg2[%c0_1, %c0_2] : memref<8x1xi32, #tpu.memory_space<vmem>>, vector<8x1xi32>
    %c8_i32 = arith.constant 8 : i32
    %2 = arith.muli %arg0, %c8_i32 : i32
    %3 = tpu.iota {dimensions = array<i32: 0>} : vector<8x1xi32>
    %4 = vector.broadcast %2 : i32 to vector<8x1xi32>
    %5 = arith.addi %4, %3 : vector<8x1xi32>
    %c8_i32_3 = arith.constant 8 : i32
    %6 = vector.broadcast %c8_i32_3 : i32 to vector<8x1xi32>
    %7 = arith.cmpi slt, %5, %6 : vector<8x1xi32>
    %cst = arith.constant dense<0x7F800000> : vector<8xf32>
    %8 = vector.multi_reduction <minimumf>, %0, %cst [1] : vector<8x16xf32> to vector<8xf32>
    %9 = vector.shape_cast %8 : vector<8xf32> to vector<8x1xf32>
    %10 = vector.broadcast %9 : vector<8x1xf32> to vector<8x16xf32>
    %11 = arith.subf %10, %0 : vector<8x16xf32>
    %12 = math.exp %11 : vector<8x16xf32>
    %cst_4 = arith.constant dense<0.000000e+00> : vector<8xf32>
    %13 = vector.multi_reduction <add>, %12, %cst_4 [1] : vector<8x16xf32> to vector<8xf32>
    %14 = vector.shape_cast %13 : vector<8xf32> to vector<8x1xf32>
    %15 = tpu.iota {dimensions = array<i32: 1>} : vector<8x16xi32>
    %16 = vector.broadcast %1 : vector<8x1xi32> to vector<8x16xi32>
    %17 = arith.cmpi eq, %15, %16 : vector<8x16xi32>
    %cst_5 = arith.constant 0.000000e+00 : f32
    %18 = vector.broadcast %cst_5 : f32 to vector<8x16xf32>
    %19 = arith.select %17, %18, %11 : vector<8x16xi1>, vector<8x16xf32>
    %cst_6 = arith.constant dense<0.000000e+00> : vector<8xf32>
    %20 = vector.multi_reduction <add>, %19, %cst_6 [1] : vector<8x16xf32> to vector<8xf32>
    %21 = vector.shape_cast %20 : vector<8xf32> to vector<8x1xf32>
    %cst_7 = arith.constant 0.000000e+00 : f32
    %cst_8 = arith.constant 0.0666666701 : f32
    %22 = arith.subf %cst_7, %cst_8 : f32
    %23 = math.log %14 : vector<8x1xf32>
    %cst_9 = arith.constant 1.500000e+01 : f32
    %24 = vector.broadcast %cst_9 : f32 to vector<8x1xf32>
    %25 = arith.mulf %24, %23 : vector<8x1xf32>
    %26 = arith.subf %21, %25 : vector<8x1xf32>
    %27 = vector.broadcast %22 : f32 to vector<8x1xf32>
    %28 = arith.mulf %27, %26 : vector<8x1xf32>
    %cst_10 = arith.constant 0.000000e+00 : f32
    %29 = vector.broadcast %cst_10 : f32 to vector<8x1xf32>
    %30 = arith.select %7, %28, %29 : vector<8x1xi1>, vector<8x1xf32>
    %31 = vector.shape_cast %30 : vector<8x1xf32> to vector<1x8x1xf32>
    %cst_11 = arith.constant dense<0.000000e+00> : vector<1xf32>
    %32 = vector.multi_reduction <add>, %31, %cst_11 [1, 2] : vector<1x8x1xf32> to vector<1xf32>
    %33 = vector.shape_cast %32 : vector<1xf32> to vector<1x1x1xf32>
    %34 = vector.extract %33[0, 0, 0] : f32 from vector<1x1x1xf32>
    %35 = vector.broadcast %34 : f32 to vector<1x1x1xf32>
    %c0_12 = arith.constant 0 : index
    %c0_13 = arith.constant 0 : index
    %c0_14 = arith.constant 0 : index
    %36 = vector.load %arg3[%c0_12, %c0_13, %c0_14] : memref<1x1x1xf32, #tpu.memory_space<vmem>>, vector<1x1x1xf32>
    tpu.vector_store %arg3[%c0_12, %c0_13, %c0_14], %35 {strides = array<i32>} : memref<1x1x1xf32, #tpu.memory_space<vmem>>, vector<1x1x1xf32>,
    return
  }
  func.func @transform_0(%arg0: i32) -> (i32, i32) {
    %c0_i32 = arith.constant 0 : i32
    %c0_i32_0 = arith.constant 0 : i32
    return %arg0, %c0_i32 : i32, i32
  }
  func.func @transform_1(%arg0: i32) -> (i32, i32) {
    %c0_i32 = arith.constant 0 : i32
    %c0_i32_0 = arith.constant 0 : i32
    return %arg0, %c0_i32 : i32, i32
  }
  func.func @transform_2(%arg0: i32) -> (i32, i32, i32) {
    %c0_i32 = arith.constant 0 : i32
    %c0_i32_0 = arith.constant 0 : i32
    %c0_i32_1 = arith.constant 0 : i32
    return %arg0, %c0_i32, %c0_i32_0 : i32, i32, i32
  }
}

</mosaic_0001>

<bundles_post_ra>
// kernel: tpu_custom_call.1
= control target key start
LH: loop header
LB: loop body
LE: loop exit
PB: predicated region body
PF: predicated region fallthrough
CT: control target
= control target key end

     0   :  { %vm20_vm0 = vcmask 130048   ;;  %s140_s0 = inlined_call_operand.vmem [shape: f32[8,16], index: 0, kind: input, shape index: {}]   ;;  %s141_s1 = inlined_call_operand.vmem [shape: s32[8,1], index: 1, kind: input, shape index: {}]   ;;  %s142_s2 = inlined_call_operand.hbm [shape: f32[1,1,1], index: 2, kind: output, shape index: {}]  }
   0x1   :  { %v12_v0 = vld [vmem:[%s140_s0] sm:$0xff] }
   0x2   :  { %7 = vsyncpa [#allocation3], 0  ;;  %v21_v1 = vsel %vm20_vm0, %v12_v0, inf  ;;  %v111_v2 = vmov 0   ;;  %v13_v3 = vld [vmem:[%s141_s1] sm:$0xff]  ;;  %v30_v9 = vlaneseq  ;;  %vm46_vm2 = vcmask 7168  }
   0x3   :  { %80 = vset.pattern.permute.xlu0 %v111_v2  ;;  %s112_s0 = smov [#allocation2]   ;;  %s67_s15 = sshll.u32 %s142_s2, 4  ;;  %vm58_vm3 = vcmask 0   ;;  %s68_s15 = int_to_ptr.hbm [resolvable:$true] %s67_s15 }
   0x4   :  { %22 = vmin.xlane.f32.xlu0 %v21_v1  ;;  %v31_v10 = vand.u32 127, %v30_v9  ;;  %s65_s1 = sshll.u32 %s112_s0, 4  ;;  %s66_s1 = int_to_ptr.vmem [resolvable:$true] %s65_s1 }
  0x18   :  { %33 = vperm.xlu0 %80, %v13_v3  }
  0x77   :  { %v23_v4 = vpop.xlane.xlu0 %22 }
  0x78   :  { %v24_v5 = vsub.f32 %v23_v4, %v12_v0 }
  0x7a   :  { %v25_v6 = vmul.f32 1.442695, %v24_v5 }
  0x7c   :  { %81 = vpow2.f32 %v25_v6 }
  0x82   :  { %v82_v7 = vpop.eup %81 }
  0x83   :  { %v27_v8 = vsel %vm20_vm0, %v82_v7, 0.0 }
  0x84   :  { %28 = vadd.xlane.f32.xlu1 %v27_v8 }
  0x8a   :  { %v34_v11 = vpop.permute.xlu0 %33 }
  0x8b   :  { %vm35_vm1 = vcmp.eq.s32.totalorder %v31_v10, %v34_v11 }
  0x8c   :  { %v36_v12 = vsel %vm35_vm1, 0.0, %v24_v5 }
  0x8d   :  { %v37_v13 = vsel %vm20_vm0, %v36_v12, 0.0 }
  0x8e   :  { %38 = vadd.xlane.f32.xlu1 %v37_v13 }
  0xf7   :  { %v29_v14 = vpop.xlane.xlu1 %28 }
  0xf8   :  { %83 = vlog2.f32 %v29_v14 }
  0xfe   :  { %v84_v15 = vpop.eup %83 }
  0xff   :  { %v41_v16 = vmul.f32 0.6931472, %v84_v15 }
 0x101   :  { %v42_v17 = vmul.f32 15.0, %v41_v16  ;;  %v39_v18 = vpop.xlane.xlu1 %38 }
 0x103   :  { %v43_v19 = vsub.f32 %v39_v18, %v42_v17 }
 0x105   :  { %v44_v20 = vmul.f32 -0.06666667, %v43_v19 }
 0x107   :  { %v47_v21 = vsel %vm46_vm2, %v44_v20, 0.0 }
 0x108   :  { %48 = vadd.xlane.f32.xlu2 %v47_v21 }
 0x17b   :  { %v49_v22 = vpop.xlane.xlu2 %48 }
 0x17c   :  { %v50_v23 = vrot.slane %v49_v22, 4 }
 0x17e   :  { %v51_v24 = vadd.f32 %v50_v23, %v49_v22 }
 0x180   :  { %v52_v25 = vrot.slane %v51_v24, 2 }
 0x182   :  { %v53_v26 = vadd.f32 %v52_v25, %v51_v24 }
 0x184   :  { %v54_v27 = vrot.slane %v53_v26, 1 }
 0x186   :  { %v55_v28 = vadd.f32 %v54_v27, %v53_v26 }
 0x188   :  { %76 = vpush %v55_v28 }
 0x1b9   :  { %s77_s16 = spop %76 }
 0x1ba   :  { %v57_v29 = vstv %s77_s16 }
 0x1bb   :  { %59 = vst.msk [vmem:[#allocation2] sm:$0x1] %vm58_vm3, %v57_v29 }
 0x1bc   :  { %70 = dma.vmem_to_hbm [thread:$0]  %s66_s1, 16, %s68_s15, [#allocation3]  }
 0x1bd   :  { %109 = dma.done.wait [#allocation3], 16  }
 0x1be   :  { %110 = vsyncadd [#allocation3], 4294967280 }
 0x1bf   :  { %75 = vsyncpa [#allocation3], 1 }

</bundles_post_ra>
